<compile_context>
chip_gen: v6e
topology: v6e:2x2x1
jax: 0.10.0
libtpu: 0.0.40
codegen_flags: <defaults>
</compile_context>

<pallas_src>
import jax
import jax.numpy as jnp
from jax.experimental import pallas as pl
from jax.experimental.pallas import tpu as pltpu


def attn_kernel(neigh_ref, ex_ref, wp_ref, we_ref, out_ref):
    Bt, N, D = neigh_ref.shape

    # One flat (Bt*N, D) view of the block -> large-M MXU GEMMs.
    neigh2d = neigh_ref[...].reshape(Bt * N, D)                       # bf16

    # Projection half and attention-logit half (both lane-aligned (D, D) weights).
    proj_n = jnp.dot(neigh2d, wp_ref[...],
                     preferred_element_type=jnp.float32).reshape(Bt, N, D)
    e_n = jnp.dot(neigh2d, we_ref[...],
                  preferred_element_type=jnp.float32).reshape(Bt, N, D)

    # Main-node contribution + bias were precomputed in the wrapper (f32).
    # ex_ref is (Bt, 1, D) in 'repeat' mode, (Bt, N, D) otherwise -> broadcast add.
    e = e_n + ex_ref[...]
    e = jnp.maximum(e, 0.01 * e)                                      # LeakyReLU(0.01)

    # Softmax over the neighbour axis, algebraically folded:
    #   out = sum_n(p * proj_n) / sum_n(p)   (never materialize a = p / sum(p))
    m = jnp.max(e, axis=1, keepdims=True)                             # (Bt, 1, D)
    p = jnp.exp(e - m)                                                # (Bt, N, D) f32
    num = jnp.sum(p * proj_n, axis=1)                                 # (Bt, D)
    den = jnp.sum(p, axis=1)                                          # (Bt, D)
    out_ref[...] = (num * pl.reciprocal(den, approx=True)).astype(out_ref.dtype)


def self_attention_forward(mainNodeEmbed, neighbourNodesEmbeds, w_W, att_W, att_b,
                           mode="repeat", block_b=None):
    """mainNodeEmbed: (B, D) in 'repeat' mode, else (B, N, D).
    neighbourNodesEmbeds: (B, N, D). Returns (B, D).
    (numTimeSteps / users / arg from the PyTorch signature do not affect the math.)"""
    B, N, D = neighbourNodesEmbeds.shape

    # nn.Linear stores weight as (out, in).  Fold w into attentionDense:
    #   e = x @ (w.T @ A_x.T) + neigh @ (w.T @ A_n.T) + b,   proj_n = neigh @ w.T
    w_T = w_W.T.astype(jnp.float32)                                   # (D, D)
    A_x = att_W[:, :D]
    A_n = att_W[:, D:]
    Wx_fused = w_T @ A_x.T                                            # (D, D)
    W_e = w_T @ A_n.T                                                 # (D, D)
    W_p = w_T                                                         # (D, D)

    if mode == "repeat":
        x3 = mainNodeEmbed.reshape(B, 1, D)
    else:
        x3 = mainNodeEmbed                                            # (B, N, D)
    Nx = x3.shape[1]

    # Main-node contribution + bias as one well-shaped XLA GEMM (kept f32).
    ex = (x3.reshape(-1, D) @ Wx_fused + att_b.reshape(1, D)).reshape(B, Nx, D)
    ex = ex.astype(jnp.float32)

    # bf16 for the dominant HBM stream + MXU inputs; softmax math stays f32.
    neigh_bf16 = neighbourNodesEmbeds.astype(jnp.bfloat16)
    W_p = W_p.astype(jnp.bfloat16)
    W_e = W_e.astype(jnp.bfloat16)

    if block_b is None:
        # Target ~512 GEMM rows per step (fills the 256-wide MXU on v6e/v7x,
        # a multiple of 128 for v5e) while never exceeding the batch.
        block_b = max(1, min(B, 512 // max(N, 1)))
        # Keep >=2 grid steps for v7x's two TensorCores, but only if that doesn't
        # shrink blocks back into the tiny-MXU / masked-store regime.
        if pl.cdiv(B, block_b) < 2:
            half = pl.cdiv(B, 2)
            if half * N >= 128:
                block_b = half
    grid_b = pl.cdiv(B, block_b)

    # Rough per-step VMEM need (double-buffered inputs/outputs + f32 intermediates),
    # clamped so the pipeline also fits v7x's 64 MiB VMEM.
    bytes_needed = (
        2 * block_b * N * D * 2          # neigh bf16
        + 2 * block_b * Nx * D * 4       # ex f32
        + 2 * 2 * D * D * 2              # two bf16 weights
        + 2 * block_b * D * 4            # output f32
        + 4 * block_b * N * D * 4        # in-kernel f32 intermediates (headroom)
    )
    vmem_limit = int(min(max(4 * bytes_needed, 16 * 2**20), 48 * 2**20))

    out = pl.pallas_call(
        attn_kernel,
        out_shape=jax.ShapeDtypeStruct((B, D), jnp.float32),
        grid_spec=pltpu.PrefetchScalarGridSpec(
            num_scalar_prefetch=0,
            grid=(grid_b,),
            in_specs=[
                pl.BlockSpec((block_b, N, D), lambda b: (b, 0, 0)),   # neighbours (bf16)
                pl.BlockSpec((block_b, Nx, D), lambda b: (b, 0, 0)),  # x-contrib + bias (f32)
                pl.BlockSpec((D, D), lambda b: (0, 0)),               # projection weight
                pl.BlockSpec((D, D), lambda b: (0, 0)),               # logit weight
            ],
            out_specs=pl.BlockSpec((block_b, D), lambda b: (b, 0)),
        ),
        compiler_params=pltpu.CompilerParams(
            dimension_semantics=("parallel",),
            vmem_limit_bytes=vmem_limit),
    )(neigh_bf16, ex, W_p, W_e)

    return out


def reference_forward(mainNodeEmbed, neigh, w_W, att_W, att_b):
    """Pure-JAX f32 mirror of the PyTorch selfAttention.forward (mode='repeat')."""
    proj_x = mainNodeEmbed @ w_W.T                                    # (B, D)
    proj_n = jnp.einsum("bnd,kd->bnk", neigh, w_W)                    # (B, N, D)
    px = jnp.broadcast_to(proj_x[:, None, :], proj_n.shape)
    cat = jnp.concatenate([px, proj_n], axis=2)                       # (B, N, 2D)
    e = jnp.einsum("bnc,kc->bnk", cat, att_W) + att_b                 # (B, N, D)
    e = jnp.where(e > 0, e, 0.01 * e)                                 # LeakyReLU
    a = jax.nn.softmax(e, axis=1)                                     # over neighbours
    return jnp.sum(a * proj_n, axis=1)                                # (B, D)


if __name__ == "__main__":
    B, N, D = 2, 8, 32   # batch, neighbours, embedding_dim

    key = jax.random.PRNGKey(0)
    k = jax.random.split(key, 5)
    mainNodeEmbed = jax.random.normal(k[0], (B, D), jnp.float32)
    neighbourNodesEmbeds = jax.random.normal(k[1], (B, N, D), jnp.float32)

    scale = 0.2
    w_W = scale * jax.random.normal(k[2], (D, D), jnp.float32)          # w.weight (out, in)
    att_W = scale * jax.random.normal(k[3], (D, 2 * D), jnp.float32)    # attentionDense.weight
    att_b = scale * jax.random.normal(k[4], (D,), jnp.float32)          # attentionDense.bias

    out = self_attention_forward(mainNodeEmbed, neighbourNodesEmbeds,
                                 w_W, att_W, att_b, mode="repeat")
    out = jax.block_until_ready(out)

    ref = reference_forward(mainNodeEmbed, neighbourNodesEmbeds, w_W, att_W, att_b)
    assert out.shape == (B, D)
    # Tolerance covers bf16 MXU inputs + approx EUP reciprocal vs the f32 reference.
    assert jnp.allclose(out, ref, atol=3e-2, rtol=3e-2), "mismatch vs reference"
    assert not bool(jnp.any(jnp.isnan(out))), "NaN in kernel output"

    # TODO(synk): non-'repeat' mode (mainNodeEmbed already (B, N, D)) is supported by
    # the same kernel via Nx=N but is not exercised by this reference check.
    print("KERNEL_OK")
</pallas_src>

<mosaic_0001>
module attributes {stable_mosaic.version = 11 : i64} {
  func.func @attn_kernel(%arg0: i32, %arg1: memref<2x8x32xbf16, #tpu.memory_space<vmem>>, %arg2: memref<2x1x32xf32, #tpu.memory_space<vmem>>, %arg3: memref<32x32xbf16, #tpu.memory_space<vmem>>, %arg4: memref<32x32xbf16, #tpu.memory_space<vmem>>, %arg5: memref<2x32xf32, #tpu.memory_space<vmem>>) attributes {dimension_semantics = [#tpu.dimension_semantics<parallel>], iteration_bounds = array<i64: 1>, scalar_prefetch = 0 : i64, scratch_operands = 0 : i64, tpu.core_type = #tpu.core_type<tc>, window_params = [{transform_indices = @transform_0, window_bounds = array<i64: 2, 8, 32>}, {transform_indices = @transform_1, window_bounds = array<i64: 2, 1, 32>}, {pipeline_mode = #tpu.pipeline_mode<synchronous>, transform_indices = @transform_2, window_bounds = array<i64: 32, 32>}, {pipeline_mode = #tpu.pipeline_mode<synchronous>, transform_indices = @transform_3, window_bounds = array<i64: 32, 32>}, {transform_indices = @transform_4, window_bounds = array<i64: 2, 32>}]} {
    %c0 = arith.constant 0 : index
    %c0_0 = arith.constant 0 : index
    %c0_1 = arith.constant 0 : index
    %0 = vector.load %arg1[%c0, %c0_0, %c0_1] : memref<2x8x32xbf16, #tpu.memory_space<vmem>>, vector<2x8x32xbf16>
    %1 = vector.shape_cast %0 : vector<2x8x32xbf16> to vector<16x32xbf16>
    %c0_2 = arith.constant 0 : index
    %c0_3 = arith.constant 0 : index
    %2 = vector.load %arg3[%c0_2, %c0_3] : memref<32x32xbf16, #tpu.memory_space<vmem>>, vector<32x32xbf16>
    %cst = arith.constant dense<0.000000e+00> : vector<16x32xf32>
    %3 = tpu.matmul %1, %2, %cst {dimension_numbers = #tpu.dot_dimension_numbers<[1], [0], [0], [1], [0, 0, 1, 1], [], []>} : vector<16x32xbf16>, vector<32x32xbf16>, vector<16x32xf32> -> vector<16x32xf32>
    %4 = vector.shape_cast %3 : vector<16x32xf32> to vector<2x8x32xf32>
    %c0_4 = arith.constant 0 : index
    %c0_5 = arith.constant 0 : index
    %5 = vector.load %arg4[%c0_4, %c0_5] : memref<32x32xbf16, #tpu.memory_space<vmem>>, vector<32x32xbf16>
    %cst_6 = arith.constant dense<0.000000e+00> : vector<16x32xf32>
    %6 = tpu.matmul %1, %5, %cst_6 {dimension_numbers = #tpu.dot_dimension_numbers<[1], [0], [0], [1], [0, 0, 1, 1], [], []>} : vector<16x32xbf16>, vector<32x32xbf16>, vector<16x32xf32> -> vector<16x32xf32>
    %7 = vector.shape_cast %6 : vector<16x32xf32> to vector<2x8x32xf32>
    %c0_7 = arith.constant 0 : index
    %c0_8 = arith.constant 0 : index
    %c0_9 = arith.constant 0 : index
    %8 = vector.load %arg2[%c0_7, %c0_8, %c0_9] : memref<2x1x32xf32, #tpu.memory_space<vmem>>, vector<2x1x32xf32>
    %9 = vector.broadcast %8 : vector<2x1x32xf32> to vector<2x8x32xf32>
    %10 = arith.addf %7, %9 : vector<2x8x32xf32>
    %cst_10 = arith.constant 0.00999999977 : f32
    %11 = vector.broadcast %cst_10 : f32 to vector<2x8x32xf32>
    %12 = arith.mulf %11, %10 : vector<2x8x32xf32>
    %13 = arith.maximumf %10, %12 : vector<2x8x32xf32>
    %cst_11 = arith.constant dense<0xFF800000> : vector<2x32xf32>
    %14 = vector.multi_reduction <maximumf>, %13, %cst_11 [1] : vector<2x8x32xf32> to vector<2x32xf32>
    %15 = vector.shape_cast %14 : vector<2x32xf32> to vector<2x1x32xf32>
    %16 = vector.broadcast %15 : vector<2x1x32xf32> to vector<2x8x32xf32>
    %17 = arith.subf %13, %16 : vector<2x8x32xf32>
    %18 = math.exp %17 : vector<2x8x32xf32>
    %19 = arith.mulf %18, %4 : vector<2x8x32xf32>
    %cst_12 = arith.constant dense<0.000000e+00> : vector<2x32xf32>
    %20 = vector.multi_reduction <add>, %19, %cst_12 [1] : vector<2x8x32xf32> to vector<2x32xf32>
    %cst_13 = arith.constant dense<0.000000e+00> : vector<2x32xf32>
    %21 = vector.multi_reduction <add>, %18, %cst_13 [1] : vector<2x8x32xf32> to vector<2x32xf32>
    %22 = tpu.reciprocal %21 {approx = true} : vector<2x32xf32> -> vector<2x32xf32>
    %23 = arith.mulf %20, %22 : vector<2x32xf32>
    %c0_14 = arith.constant 0 : index
    %c0_15 = arith.constant 0 : index
    %24 = vector.load %arg5[%c0_14, %c0_15] : memref<2x32xf32, #tpu.memory_space<vmem>>, vector<2x32xf32>
    tpu.vector_store %arg5[%c0_14, %c0_15], %23 {strides = array<i32>} : memref<2x32xf32, #tpu.memory_space<vmem>>, vector<2x32xf32>,
    return
  }
  func.func @transform_0(%arg0: i32) -> (i32, i32, i32) {
    %c0_i32 = arith.constant 0 : i32
    %c0_i32_0 = arith.constant 0 : i32
    %c0_i32_1 = arith.constant 0 : i32
    return %arg0, %c0_i32, %c0_i32_0 : i32, i32, i32
  }
  func.func @transform_1(%arg0: i32) -> (i32, i32, i32) {
    %c0_i32 = arith.constant 0 : i32
    %c0_i32_0 = arith.constant 0 : i32
    %c0_i32_1 = arith.constant 0 : i32
    return %arg0, %c0_i32, %c0_i32_0 : i32, i32, i32
  }
  func.func @transform_2(%arg0: i32) -> (i32, i32) {
    %c0_i32 = arith.constant 0 : i32
    %c0_i32_0 = arith.constant 0 : i32
    %c0_i32_1 = arith.constant 0 : i32
    return %c0_i32, %c0_i32_0 : i32, i32
  }
  func.func @transform_3(%arg0: i32) -> (i32, i32) {
    %c0_i32 = arith.constant 0 : i32
    %c0_i32_0 = arith.constant 0 : i32
    %c0_i32_1 = arith.constant 0 : i32
    return %c0_i32, %c0_i32_0 : i32, i32
  }
  func.func @transform_4(%arg0: i32) -> (i32, i32) {
    %c0_i32 = arith.constant 0 : i32
    %c0_i32_0 = arith.constant 0 : i32
    return %arg0, %c0_i32 : i32, i32
  }
}

</mosaic_0001>

<bundles_post_ra>
// kernel: tpu_custom_call.1
= control target key start
LH: loop header
LB: loop body
LE: loop exit
PB: predicated region body
PF: predicated region fallthrough
CT: control target
= control target key end

     0   :  { %9 = vsyncpa [#allocation3], 0  ;;  %s519_s0 = inlined_call_operand.hbm [shape: bf16[2,8,32], index: 0, kind: input, shape index: {}]   ;;  %s520_s1 = inlined_call_operand.hbm [shape: f32[2,1,32], index: 1, kind: input, shape index: {}]   ;;  %s521_s2 = inlined_call_operand.hbm [shape: bf16[32,32], index: 2, kind: input, shape index: {}]   ;;  %s522_s3 = inlined_call_operand.hbm [shape: bf16[32,32], index: 3, kind: input, shape index: {}]   ;;  %s523_s4 = inlined_call_operand.hbm [shape: f32[2,32], index: 4, kind: output, shape index: {}]  }
   0x1   :  { %10 = vsyncpa [#allocation6], 0 }
   0x2   :  { %11 = vsyncpa [#allocation9], 0 }
   0x3   :  { %12 = vsyncpa [#allocation4], 0  ;;  %s460_s15 = smov [#allocation5]  }
   0x4   :  { %s30_s16 = sshll.u32 %s460_s15, 4  ;;  %s31_s16 = int_to_ptr.vmem [resolvable:$true] %s30_s16 }
   0x5   :  { %s360_s17 = scalar_lea.vmem %s31_s16, 32  ;;  %p365_p1 = scmp.lt.s32.totalorder %s31_s16, %s31_s16 }
   0x6   :  { %p361_p0 = scmp.ne.s32.totalorder %s31_s16, %s360_s17  ;;  %p366_p2 = scmp.lt.s32.totalorder %s360_s17, %s360_s17 }
   0x8   :  { %p367_p3 = por %p366_p2, %p365_p1 }
   0xa   :  { %p368_p4 = pnand %p367_p3, %p361_p0 }
   0xc   :  { %371 = shalt.err (!%p368_p4)
}
   0xd   :  { %s461_s18 = smov 16   ;;  %s462_s19 = smov 1  }
   0xe   :  { %36 = dma.hbm_to_vmem [thread:$0]  %s520_s1, 32, %s31_s16, [#allocation6], %s461_s18, %s461_s18, %s462_s19  }
   0xf   :  { %s463_s22 = smov [#allocation2]  }
  0x10   :  { %s18_s23 = sshll.u32 %s463_s22, 4  ;;  %s19_s23 = int_to_ptr.vmem [resolvable:$true] %s18_s23 }
  0x11   :  { %s380_s24 = scalar_lea.vmem %s19_s23, 128  ;;  %p385_p6 = scmp.lt.s32.totalorder %s19_s23, %s19_s23 }
  0x12   :  { %p381_p5 = scmp.ne.s32.totalorder %s19_s23, %s380_s24  ;;  %p386_p7 = scmp.lt.s32.totalorder %s380_s24, %s380_s24 }
  0x14   :  { %p387_p8 = por %p386_p7, %p385_p6 }
  0x16   :  { %p388_p9 = pnand %p387_p8, %p381_p5 }
  0x18   :  { %391 = shalt.err (!%p388_p9)
}
  0x19   :  { %s464_s25 = smov 64   ;;  %s465_s26 = smov 4  }
  0x1a   :  { %24 = dma.hbm_to_vmem [thread:$0]  %s519_s0, 128, %s19_s23, [#allocation3], %s464_s25, %s464_s25, %s465_s26  }
  0x1b   :  { %s466_s29 = smov [#allocation7]   ;;  %s467_s5 = smov [#allocation8]  }
  0x1c   :  { %s42_s30 = sshll.u32 %s466_s29, 4  ;;  %s54_s1 = sshll.u32 %s467_s5, 4  ;;  %s43_s30 = int_to_ptr.vmem [resolvable:$true] %s42_s30  ;;  %s55_s1 = int_to_ptr.vmem [resolvable:$true] %s54_s1 }
  0x1d   :  { %s400_s6 = scalar_lea.vmem %s43_s30, 256  ;;  %p405_p11 = scmp.lt.s32.totalorder %s43_s30, %s43_s30 }
  0x1e   :  { %p401_p10 = scmp.ne.s32.totalorder %s43_s30, %s400_s6  ;;  %p406_p12 = scmp.lt.s32.totalorder %s400_s6, %s400_s6 }
  0x20   :  { %p407_p13 = por %p406_p12, %p405_p11 }
  0x22   :  { %p408_p0 = pnand %p407_p13, %p401_p10 }
  0x24   :  { %411 = shalt.err (!%p408_p0)
}
  0x25   :  { %48 = dma.hbm_to_vmem [thread:$0]  %s521_s2, 256, %s43_s30, [#allocation6], %s464_s25, %s464_s25, %s465_s26  }
  0x26   :  { %s420_s9 = scalar_lea.vmem %s55_s1, 256  ;;  %p425_p2 = scmp.lt.s32.totalorder %s55_s1, %s55_s1 }
  0x27   :  { %p421_p1 = scmp.ne.s32.totalorder %s55_s1, %s420_s9  ;;  %p426_p3 = scmp.lt.s32.totalorder %s420_s9, %s420_s9 }
  0x29   :  { %p427_p4 = por %p426_p3, %p425_p2 }
  0x2b   :  { %p428_p5 = pnand %p427_p4, %p421_p1 }
  0x2d   :  { %431 = shalt.err (!%p428_p5)
}
  0x2e   :  { %60 = dma.hbm_to_vmem [thread:$0]  %s522_s3, 256, %s55_s1, [#allocation9], %s464_s25, %s464_s25, %s465_s26  }
  0x2f   :  { %452 = dma.done.wait [#allocation3], 128  }
  0x30   :  { %453 = vsyncadd [#allocation3], 4294967168 }
  0x31   :  { %454 = dma.done.wait [#allocation6], 288  }
  0x32   :  { %455 = vsyncadd [#allocation6], 4294967008 }
  0x33   :  { %456 = dma.done.wait [#allocation9], 256  }
  0x34   :  { %457 = vsyncadd [#allocation9], 4294967040  ;;  %v468_v0 = vmov 0.0   ;;  %vm469_vm0 = vmmov 0   ;;  %v339_v1 = vld [vmem:[#allocation8 + $0x8] sm:$0xff]   ;;  %v340_v2 = vld [vmem:[#allocation8] sm:$0xff]  }
  0x35   :  { %320 = vmatprep.subr.bf16.mxu1 %v468_v0  ;;  %324 = vmatprep.mubr.msk.bf16.mxu1 %vm469_vm0, %v468_v0  ;;  %v342_v3 = vld [vmem:[#allocation7 + $0x8] sm:$0xff]   ;;  %v341_v4 = vld [vmem:[#allocation2] sm:$0xff]   ;;  %v343_v5 = vld [vmem:[#allocation7] sm:$0xff]   ;;  %vm97_vm1 = vcmask 261120   ;;  %s470_s2 = smov [#allocation10]   ;;  %vm275_vm2 = vcmask 1041409  }
  0x36   :  { %312 = vmatprep.subr.bf16.mxu0 %v468_v0  ;;  %316 = vmatprep.mubr.msk.bf16.mxu0 %vm469_vm0, %v468_v0  ;;  %v304_v6 = vld [vmem:[#allocation5] ss:$0 sm:$0xff]  ;;  %v305_v10 = vld [vmem:[#allocation5 + $0x1] ss:$0 sm:$0xff]  ;;  %s286_s3 = sshll.u32 %s470_s2, 4  ;;  %vm278_vm3 = vcmask 254976   ;;  %s287_s3 = int_to_ptr.vmem [resolvable:$true] %s286_s3 }
  0x37   :  { %321 = vmatpush3.bf16.msra.mxu1 %v339_v1  ;;  %313 = vmatpush3.bf16.msra.mxu0 %v342_v3  ;;  %s432_s11 = scalar_lea.vmem %s287_s3, 32  ;;  %p437_p7 = scmp.lt.s32.totalorder %s287_s3, %s287_s3 }
  0x38   :  { %322 = vmatprep.subr.bf16.mxu1 %v468_v0  ;;  %314 = vmatprep.subr.bf16.mxu0 %v468_v0  ;;  %p433_p6 = scmp.ne.s32.totalorder %s287_s3, %s432_s11  ;;  %p438_p8 = scmp.lt.s32.totalorder %s432_s11, %s432_s11 }
  0x3a   :  { %p439_p9 = por %p438_p8, %p437_p7 }
  0x3b   :  { %323 = vmatpush3.bf16.msra.mxu1 %v340_v2  ;;  %315 = vmatpush3.bf16.msra.mxu0 %v343_v5 }
  0x3c   :  { %p440_p10 = pnand %p439_p9, %p433_p6 }
  0x3e   :  { %325 = vmatmul.mubr.msk.bf16.vlgmr.msra.gmra.mxu1 %vm97_vm1, %v341_v4  ;;  %317 = vmatmul.mubr.msk.bf16.vlgmr.msra.gmra.mxu0 %vm97_vm1, %v341_v4 }
  0xfe   :  { %v192_v7 = vpop.f32.mrf.mxu1  ;;  %v135_v12 = vpop.f32.mrf.mxu0 }
  0xff   :  { %v213_v8 = vadd.f32 %v304_v6, %v192_v7 }
 0x100   :  { %v326_v9 = vpop.f32.mrf.mxu1  ;;  %v318_v16 = vpop.f32.mrf.mxu0 }
 0x101   :  { %v215_v11 = vmul.f32 0.01, %v213_v8 }
 0x102   :  { %v195_v13 = vpop.f32.mrf.mxu1  ;;  %v138_v20 = vpop.f32.mrf.mxu0 }
 0x103   :  { %v217_v14 = vmax.f32 %v213_v8, %v215_v11  ;;  %v214_v15 = vadd.f32 %v305_v10, %v195_v13 }
 0x104   :  { %v327_v17 = vpop.f32.mrf.mxu1  ;;  %v319_v23 = vpop.f32.mrf.mxu0 }
 0x105   :  { %v219_v18 = vsel %vm97_vm1, %v217_v14, -inf  ;;  %v216_v19 = vmul.f32 0.01, %v214_v15 }
 0x106   :  { %v220_v21 = vrot.slane %v219_v18, 4 }
 0x107   :  { %v218_v22 = vmax.f32 %v214_v15, %v216_v19 }
 0x108   :  { %v221_v24 = vmax.f32 %v219_v18, %v220_v21 }
 0x109   :  { %v226_v25 = vsel %vm97_vm1, %v218_v22, -inf }
 0x10a   :  { %v222_v26 = vrot.slane %v221_v24, 2  ;;  %v227_v27 = vrot.slane %v226_v25, 4 }
 0x10c   :  { %v223_v28 = vmax.f32 %v221_v24, %v222_v26  ;;  %v228_v29 = vmax.f32 %v226_v25, %v227_v27 }
 0x10e   :  { %v224_v30 = vrot.slane %v223_v28, 1  ;;  %v229_v31 = vrot.slane %v228_v29, 2 }
 0x110   :  { %v225_v32 = vmax.f32 %v223_v28, %v224_v30  ;;  %v230_v33 = vmax.f32 %v228_v29, %v229_v31 }
 0x112   :  { %v233_v34 = vsub.f32 %v217_v14, %v225_v32  ;;  %v231_v35 = vrot.slane %v230_v33, 1 }
 0x114   :  { %v235_v36 = vmul.f32 1.442695, %v233_v34  ;;  %v232_v37 = vmax.f32 %v230_v33, %v231_v35 }
 0x116   :  { %344 = vpow2.f32 %v235_v36  ;;  %v234_v38 = vsub.f32 %v218_v22, %v232_v37 }
 0x118   :  { %v237_v39 = vmul.f32 1.442695, %v234_v38 }
 0x11a   :  { %346 = vpow2.f32 %v237_v39 }
 0x123   :  { %v345_v40 = vpop.eup %344 }
 0x124   :  { %v255_v41 = vsel %vm97_vm1, %v345_v40, 0.0  ;;  %v239_v43 = vmul.f32 %v345_v40, %v135_v12 }
 0x125   :  { %v256_v42 = vrot.slane %v255_v41, 4 }
 0x126   :  { %v241_v50 = vsel %vm97_vm1, %v239_v43, 0.0 }
 0x127   :  { %v347_v44 = vpop.eup %346  ;;  %v257_v45 = vadd.f32 %v256_v42, %v255_v41  ;;  %v242_v56 = vrot.slane %v241_v50, 4 }
 0x128   :  { %v262_v46 = vsel %vm97_vm1, %v347_v44, 0.0  ;;  %v240_v47 = vmul.f32 %v347_v44, %v138_v20 }
 0x129   :  { %v258_v48 = vrot.slane %v257_v45, 2  ;;  %v263_v49 = vrot.slane %v262_v46, 4  ;;  %v243_v61 = vadd.f32 %v242_v56, %v241_v50 }
 0x12a   :  { %v248_v51 = vsel %vm97_vm1, %v240_v47, 0.0 }
 0x12b   :  { %v259_v52 = vadd.f32 %v258_v48, %v257_v45  ;;  %v264_v53 = vadd.f32 %v263_v49, %v262_v46  ;;  %v249_v57 = vrot.slane %v248_v51, 4  ;;  %v244_v0 = vrot.slane %v243_v61, 2 }
 0x12d   :  { %v260_v54 = vrot.slane %v259_v52, 1  ;;  %v265_v55 = vrot.slane %v264_v53, 2  ;;  %v250_v62 = vadd.f32 %v249_v57, %v248_v51  ;;  %v245_v2 = vadd.f32 %v244_v0, %v243_v61 }
 0x12f   :  { %v266_v58 = vadd.f32 %v265_v55, %v264_v53  ;;  %v261_v59 = vadd.f32 %v260_v54, %v259_v52  ;;  %v251_v1 = vrot.slane %v250_v62, 2  ;;  %v246_v4 = vrot.slane %v245_v2, 1 }
 0x131   :  { %v267_v60 = vrot.slane %v266_v58, 1  ;;  %348 = vrcp.f32 %v261_v59  ;;  %v252_v3 = vadd.f32 %v251_v1, %v250_v62  ;;  %v247_v7 = vadd.f32 %v246_v4, %v245_v2 }
 0x133   :  { %v268_v63 = vadd.f32 %v267_v60, %v266_v58  ;;  %v253_v5 = vrot.slane %v252_v3, 1 }
 0x135   :  { %350 = vrcp.f32 %v268_v63  ;;  %v254_v8 = vadd.f32 %v253_v5, %v252_v3 }
 0x13e   :  { %v349_v6 = vpop.eup %348 }
 0x13f   :  { %v271_v10 = vmul.f32 %v349_v6, %v247_v7 }
 0x142   :  { %v351_v9 = vpop.eup %350 }
 0x143   :  { %v272_v11 = vmul.f32 %v351_v9, %v254_v8 }
 0x145   :  { %v276_v12 = vsel %vm275_vm2, %v272_v11, %v271_v10 }
 0x146   :  { %279 = vst.msk [vmem:[#allocation10] sm:$0x3] %vm278_vm3, %v276_v12 }
 0x147   :  { %443 = shalt.err (!%p440_p10)
}
 0x148   :  { %289 = dma.vmem_to_hbm [thread:$0]  %s287_s3, 32, %s523_s4, [#allocation4]  }
 0x149   :  { %458 = dma.done.wait [#allocation4], 32  }
 0x14a   :  { %459 = vsyncadd [#allocation4], 4294967264 }
 0x14b   :  { %293 = vsyncpa [#allocation3], 1 }
 0x14c   :  { %294 = vsyncpa [#allocation6], 1 }
 0x14d   :  { %295 = vsyncpa [#allocation9], 1 }
 0x14e   :  { %296 = vsyncpa [#allocation4], 1 }

</bundles_post_ra>
